<compile_context>
chip_gen: v7x
topology: tpu7x:2x2x1
jax: 0.10.0
libtpu: 0.0.40
codegen_flags: <defaults>
</compile_context>

<pallas_src>
import jax
import jax.numpy as jnp
from jax.experimental import pallas as pl
from jax.experimental.pallas import tpu as pltpu


_NEG_LARGE = -1e30  # finite "-inf": padded class columns contribute exp(...) == 0


def _round_up(x, m):
    return ((x + m - 1) // m) * m


def _cce_kernel(logits_ref, target_ref, loss_ref, m_ref, l_ref, t_ref):
    """Online log-sum-exp cross entropy over class tiles.

    grid = (n_tiles, c_tiles); C is the carried reduction axis (last).
    Scratch (all [TILE_N, 1] f32):
      m_ref: running row max, l_ref: running sum(exp(x - m)), t_ref: target logit.
    """
    j = pl.program_id(1)

    @pl.when(j == 0)
    def _():
        m_ref[...] = jnp.full_like(m_ref, -jnp.inf)
        l_ref[...] = jnp.zeros_like(l_ref)
        t_ref[...] = jnp.zeros_like(t_ref)

    logits = logits_ref[...].astype(jnp.float32)      # [TN, TC] (upcast per-vreg)
    targets = target_ref[...]                         # [TN, 1] int32
    tn, tc = logits.shape

    # --- online logsumexp update ---
    tile_max = jnp.max(logits, axis=-1, keepdims=True)         # [TN, 1]
    m_new = jnp.maximum(m_ref[...], tile_max)
    alpha = jnp.exp(m_ref[...] - m_new)                         # == 0 on first tile
    p = jnp.exp(logits - m_new)                                 # [TN, TC]
    l_ref[...] = alpha * l_ref[...] + jnp.sum(p, axis=-1, keepdims=True)
    m_ref[...] = m_new

    # --- gather the target logit covered by this class tile (no one-hot mult) ---
    col0 = j * tc
    cols = col0 + jax.lax.broadcasted_iota(jnp.int32, (tn, tc), 1)
    t_ref[...] += jnp.sum(
        jnp.where(cols == targets, logits, 0.0), axis=-1, keepdims=True)

    # --- finalize per-example loss once the full row has been seen ---
    @pl.when(j == pl.num_programs(1) - 1)
    def _():
        # loss = logsumexp(row) - logit[target] = m + log(l) - t
        loss_ref[...] = m_ref[...] + jnp.log(l_ref[...]) - t_ref[...]


def cce_loss(output, target, index=None, mode=None, *, tile_n=None, tile_c=None):
    """Pallas equivalent of CCELoss.forward (index/mode unused, as in the module)."""
    # TODO(synk): no ignore_index / class-weight handling (module relies on
    # F.cross_entropy defaults with valid in-range targets).
    n, c = output.shape

    # ---- tile selection: keep double-buffered input tiles well under scoped VMEM ----
    if tile_c is None:
        tile_c = min(_round_up(c, 128), 2048)       # <= 2048 lanes per tile
    if tile_n is None:
        tile_n = min(_round_up(n, 8), 256)          # <= 256 rows per tile
    c_pad = _round_up(c, tile_c)
    n_pad = _round_up(n, tile_n)

    # pad classes with a large negative (zero LSE contribution), then pad rows with 0
    logits = output
    if c_pad != c:
        logits = jnp.pad(logits, ((0, 0), (0, c_pad - c)),
                         constant_values=_NEG_LARGE)
    if n_pad != n:
        logits = jnp.pad(logits, ((0, n_pad - n), (0, 0)), constant_values=0.0)

    tgt = target.astype(jnp.int32).reshape(n, 1)
    if n_pad != n:
        tgt = jnp.pad(tgt, ((0, n_pad - n), (0, 0)), constant_values=0)

    grid = (n_pad // tile_n, c_pad // tile_c)
    bytes_per_elem = jnp.dtype(logits.dtype).itemsize

    per_example = pl.pallas_call(
        _cce_kernel,
        out_shape=jax.ShapeDtypeStruct((n_pad, 1), jnp.float32),
        grid_spec=pltpu.PrefetchScalarGridSpec(
            num_scalar_prefetch=0,
            grid=grid,
            in_specs=[
                pl.BlockSpec((tile_n, tile_c), lambda i, j: (i, j)),
                pl.BlockSpec((tile_n, 1), lambda i, j: (i, 0)),
            ],
            out_specs=pl.BlockSpec((tile_n, 1), lambda i, j: (i, 0)),
            scratch_shapes=[
                pltpu.VMEM((tile_n, 1), jnp.float32),   # running max
                pltpu.VMEM((tile_n, 1), jnp.float32),   # running sum-exp
                pltpu.VMEM((tile_n, 1), jnp.float32),   # target logit
            ],
        ),
        compiler_params=pltpu.CompilerParams(
            dimension_semantics=("parallel", "arbitrary"),
            vmem_limit_bytes=32 * 1024 * 1024,
        ),
        cost_estimate=pl.CostEstimate(
            flops=5 * n_pad * c_pad,
            transcendentals=n_pad * c_pad,
            bytes_accessed=n_pad * c_pad * bytes_per_elem + n_pad * 8,
        ),
    )(logits, tgt)

    # mean over the real batch (tiny reduction, done once outside the kernel)
    return jnp.sum(per_example[:n, 0]) / jnp.float32(n)


if __name__ == "__main__":
    key = jax.random.PRNGKey(0)
    k_logits, k_tgt = jax.random.split(key)

    # deliberately non-aligned shapes to exercise N/C padding and a (2, 3) grid
    N, C = 12, 300
    logits = jax.random.normal(k_logits, (N, C), dtype=jnp.float32)
    targets = jax.random.randint(k_tgt, (N,), 0, C, dtype=jnp.int32)

    loss = cce_loss(logits, targets, index=None, mode=None, tile_n=8, tile_c=128)
    jax.block_until_ready(loss)

    # reference check (plain JAX)
    lse = jax.scipy.special.logsumexp(logits.astype(jnp.float32), axis=-1)
    ref = jnp.mean(lse - logits[jnp.arange(N), targets])
    assert jnp.allclose(loss, ref, rtol=1e-5, atol=1e-5), (loss, ref)

    print("KERNEL_OK")
</pallas_src>

<mosaic_0001>
module attributes {stable_mosaic.version = 11 : i64} {
  func.func @_cce_kernel(%arg0: i32, %arg1: i32, %arg2: memref<8x128xf32, #tpu.memory_space<vmem>>, %arg3: memref<8x1xi32, #tpu.memory_space<vmem>>, %arg4: memref<8x1xf32, #tpu.memory_space<vmem>>, %arg5: memref<8x1xf32, #tpu.memory_space<vmem>>, %arg6: memref<8x1xf32, #tpu.memory_space<vmem>>, %arg7: memref<8x1xf32, #tpu.memory_space<vmem>>) attributes {dimension_semantics = [#tpu.dimension_semantics<parallel>, #tpu.dimension_semantics<arbitrary>], iteration_bounds = array<i64: 2, 3>, scalar_prefetch = 0 : i64, scratch_operands = 3 : i64, tpu.core_type = #tpu.core_type<tc>, window_params = [{transform_indices = @transform_0, window_bounds = array<i64: 8, 128>}, {transform_indices = @transform_1, window_bounds = array<i64: 8, 1>}, {transform_indices = @transform_2, window_bounds = array<i64: 8, 1>}]} {
    %c0_i32 = arith.constant 0 : i32
    %0 = arith.cmpi eq, %arg1, %c0_i32 : i32
    %1 = arith.extui %0 : i1 to i32
    %c0_i32_0 = arith.constant 0 : i32
    %2 = arith.cmpi ne, %1, %c0_i32_0 : i32
    scf.if %2 {
      %cst_22 = arith.constant 0xFF800000 : f32
      %38 = vector.broadcast %cst_22 : f32 to vector<8x1xf32>
      %c0_23 = arith.constant 0 : index
      %c0_24 = arith.constant 0 : index
      %39 = vector.load %arg5[%c0_23, %c0_24] : memref<8x1xf32, #tpu.memory_space<vmem>>, vector<8x1xf32>
      tpu.vector_store %arg5[%c0_23, %c0_24], %38 {strides = array<i32>} : memref<8x1xf32, #tpu.memory_space<vmem>>, vector<8x1xf32>,
      %cst_25 = arith.constant 0.000000e+00 : f32
      %40 = vector.broadcast %cst_25 : f32 to vector<8x1xf32>
      %c0_26 = arith.constant 0 : index
      %c0_27 = arith.constant 0 : index
      %41 = vector.load %arg6[%c0_26, %c0_27] : memref<8x1xf32, #tpu.memory_space<vmem>>, vector<8x1xf32>
      tpu.vector_store %arg6[%c0_26, %c0_27], %40 {strides = array<i32>} : memref<8x1xf32, #tpu.memory_space<vmem>>, vector<8x1xf32>,
      %cst_28 = arith.constant 0.000000e+00 : f32
      %42 = vector.broadcast %cst_28 : f32 to vector<8x1xf32>
      %c0_29 = arith.constant 0 : index
      %c0_30 = arith.constant 0 : index
      %43 = vector.load %arg7[%c0_29, %c0_30] : memref<8x1xf32, #tpu.memory_space<vmem>>, vector<8x1xf32>
      tpu.vector_store %arg7[%c0_29, %c0_30], %42 {strides = array<i32>} : memref<8x1xf32, #tpu.memory_space<vmem>>, vector<8x1xf32>,
    } else {
    }
    %c0 = arith.constant 0 : index
    %c0_1 = arith.constant 0 : index
    %3 = vector.load %arg2[%c0, %c0_1] : memref<8x128xf32, #tpu.memory_space<vmem>>, vector<8x128xf32>
    %c0_2 = arith.constant 0 : index
    %c0_3 = arith.constant 0 : index
    %4 = vector.load %arg3[%c0_2, %c0_3] : memref<8x1xi32, #tpu.memory_space<vmem>>, vector<8x1xi32>
    %cst = arith.constant dense<0xFF800000> : vector<8xf32>
    %5 = vector.multi_reduction <maximumf>, %3, %cst [1] : vector<8x128xf32> to vector<8xf32>
    %6 = vector.shape_cast %5 : vector<8xf32> to vector<8x1xf32>
    %c0_4 = arith.constant 0 : index
    %c0_5 = arith.constant 0 : index
    %7 = vector.load %arg5[%c0_4, %c0_5] : memref<8x1xf32, #tpu.memory_space<vmem>>, vector<8x1xf32>
    %8 = arith.maximumf %7, %6 : vector<8x1xf32>
    %c0_6 = arith.constant 0 : index
    %c0_7 = arith.constant 0 : index
    %9 = vector.load %arg5[%c0_6, %c0_7] : memref<8x1xf32, #tpu.memory_space<vmem>>, vector<8x1xf32>
    %10 = arith.subf %9, %8 : vector<8x1xf32>
    %11 = math.exp %10 : vector<8x1xf32>
    %12 = vector.broadcast %8 : vector<8x1xf32> to vector<8x128xf32>
    %13 = arith.subf %3, %12 : vector<8x128xf32>
    %14 = math.exp %13 : vector<8x128xf32>
    %c0_8 = arith.constant 0 : index
    %c0_9 = arith.constant 0 : index
    %15 = vector.load %arg6[%c0_8, %c0_9] : memref<8x1xf32, #tpu.memory_space<vmem>>, vector<8x1xf32>
    %16 = arith.mulf %11, %15 : vector<8x1xf32>
    %cst_10 = arith.constant dense<0.000000e+00> : vector<8xf32>
    %17 = vector.multi_reduction <add>, %14, %cst_10 [1] : vector<8x128xf32> to vector<8xf32>
    %18 = vector.shape_cast %17 : vector<8xf32> to vector<8x1xf32>
    %19 = arith.addf %16, %18 : vector<8x1xf32>
    %c0_11 = arith.constant 0 : index
    %c0_12 = arith.constant 0 : index
    %20 = vector.load %arg6[%c0_11, %c0_12] : memref<8x1xf32, #tpu.memory_space<vmem>>, vector<8x1xf32>
    tpu.vector_store %arg6[%c0_11, %c0_12], %19 {strides = array<i32>} : memref<8x1xf32, #tpu.memory_space<vmem>>, vector<8x1xf32>,
    %c0_13 = arith.constant 0 : index
    %c0_14 = arith.constant 0 : index
    %21 = vector.load %arg5[%c0_13, %c0_14] : memref<8x1xf32, #tpu.memory_space<vmem>>, vector<8x1xf32>
    tpu.vector_store %arg5[%c0_13, %c0_14], %8 {strides = array<i32>} : memref<8x1xf32, #tpu.memory_space<vmem>>, vector<8x1xf32>,
    %c128_i32 = arith.constant 128 : i32
    %22 = arith.muli %arg1, %c128_i32 : i32
    %23 = tpu.iota {dimensions = array<i32: 1>} : vector<8x128xi32>
    %24 = vector.broadcast %22 : i32 to vector<8x128xi32>
    %25 = arith.addi %24, %23 : vector<8x128xi32>
    %c0_15 = arith.constant 0 : index
    %c0_16 = arith.constant 0 : index
    %26 = vector.load %arg7[%c0_15, %c0_16] : memref<8x1xf32, #tpu.memory_space<vmem>>, vector<8x1xf32>
    %27 = vector.broadcast %4 : vector<8x1xi32> to vector<8x128xi32>
    %28 = arith.cmpi eq, %25, %27 : vector<8x128xi32>
    %cst_17 = arith.constant 0.000000e+00 : f32
    %29 = vector.broadcast %cst_17 : f32 to vector<8x128xf32>
    %30 = arith.select %28, %3, %29 : vector<8x128xi1>, vector<8x128xf32>
    %cst_18 = arith.constant dense<0.000000e+00> : vector<8xf32>
    %31 = vector.multi_reduction <add>, %30, %cst_18 [1] : vector<8x128xf32> to vector<8xf32>
    %32 = vector.shape_cast %31 : vector<8xf32> to vector<8x1xf32>
    %33 = arith.addf %26, %32 : vector<8x1xf32>
    %c0_19 = arith.constant 0 : index
    %c0_20 = arith.constant 0 : index
    %34 = vector.load %arg7[%c0_19, %c0_20] : memref<8x1xf32, #tpu.memory_space<vmem>>, vector<8x1xf32>
    tpu.vector_store %arg7[%c0_19, %c0_20], %33 {strides = array<i32>} : memref<8x1xf32, #tpu.memory_space<vmem>>, vector<8x1xf32>,
    %c2_i32 = arith.constant 2 : i32
    %35 = arith.cmpi eq, %arg1, %c2_i32 : i32
    %36 = arith.extui %35 : i1 to i32
    %c0_i32_21 = arith.constant 0 : i32
    %37 = arith.cmpi ne, %36, %c0_i32_21 : i32
    scf.if %37 {
      %c0_22 = arith.constant 0 : index
      %c0_23 = arith.constant 0 : index
      %38 = vector.load %arg5[%c0_22, %c0_23] : memref<8x1xf32, #tpu.memory_space<vmem>>, vector<8x1xf32>
      %c0_24 = arith.constant 0 : index
      %c0_25 = arith.constant 0 : index
      %39 = vector.load %arg6[%c0_24, %c0_25] : memref<8x1xf32, #tpu.memory_space<vmem>>, vector<8x1xf32>
      %40 = math.log %39 : vector<8x1xf32>
      %41 = arith.addf %38, %40 : vector<8x1xf32>
      %c0_26 = arith.constant 0 : index
      %c0_27 = arith.constant 0 : index
      %42 = vector.load %arg7[%c0_26, %c0_27] : memref<8x1xf32, #tpu.memory_space<vmem>>, vector<8x1xf32>
      %43 = arith.subf %41, %42 : vector<8x1xf32>
      %c0_28 = arith.constant 0 : index
      %c0_29 = arith.constant 0 : index
      %44 = vector.load %arg4[%c0_28, %c0_29] : memref<8x1xf32, #tpu.memory_space<vmem>>, vector<8x1xf32>
      tpu.vector_store %arg4[%c0_28, %c0_29], %43 {strides = array<i32>} : memref<8x1xf32, #tpu.memory_space<vmem>>, vector<8x1xf32>,
    } else {
    }
    return
  }
  func.func @transform_0(%arg0: i32, %arg1: i32) -> (i32, i32) {
    %c0_i32 = arith.constant 0 : i32
    return %arg0, %arg1 : i32, i32
  }
  func.func @transform_1(%arg0: i32, %arg1: i32) -> (i32, i32) {
    %c0_i32 = arith.constant 0 : i32
    %c0_i32_0 = arith.constant 0 : i32
    return %arg0, %c0_i32 : i32, i32
  }
  func.func @transform_2(%arg0: i32, %arg1: i32) -> (i32, i32) {
    %c0_i32 = arith.constant 0 : i32
    %c0_i32_0 = arith.constant 0 : i32
    return %arg0, %c0_i32 : i32, i32
  }
}

</mosaic_0001>

<bundles_post_ra>
// kernel: tpu_custom_call.1
= control target key start
LH: loop header
LB: loop body
LE: loop exit
PB: predicated region body
PF: predicated region fallthrough
CT: control target
= control target key end

     0   :  { %7 = vsyncpa [#allocation6], 0  ;;  %s720_s0 = inlined_call_operand.hbm [shape: f32[16,384], index: 0, kind: input, shape index: {}]   ;;  %s721_s1 = inlined_call_operand.vmem [shape: s32[16,1], index: 1, kind: input, shape index: {}]   ;;  %s722_s2 = inlined_call_operand.vmem [shape: f32[16,1], index: 2, kind: output, shape index: {}]  }
   0x1   :  { %9 = vsyncpa [#allocation6 + $0x1], 0  ;;  %s557_s9 = smov 0   ;;  %s559_s10 = smov 0  }
   0x2   :  { %s561_s11 = smov 0   ;;  %s563_s12 = smov 0  }
   0x3   :  { %s565_s13 = smov 0   ;;  %s567_s14 = smov 0  }
   0x4   :  { %s569_s15 = smov 0   ;;  %s571_s16 = smov 0  }
   0x5 LB: > { %s342_s17 = sadd.s32 4294967295, %s536_s16   ;;  %s24_s18 = sadd.s32 1, %s528_s14  ;;  %s536_s16 = sphi %s571_s16, %s15_s16   ;;  %s532_s15 = sphi %s569_s15, %s734_s15   ;;  %s528_s14 = sphi %s567_s14, %s733_s14   ;;  %s524_s13 = sphi %s565_s13, %s732_s13   ;;  %s520_s12 = sphi %s563_s12, %s731_s12   ;;  %s516_s11 = sphi %s561_s11, %s730_s11   ;;  %s512_s10 = sphi %s559_s10, %s729_s10   ;;  %s508_s9 = sphi %s557_s9, %s728_s9  }
   0x6   : > { %p25_p0 = scmp.ge.s32.totalorder %s24_s18, 3  ;;  %s27_s19 = sadd.s32 1, %s532_s15 }
   0x7   : > { %s36_s20 = sadd.s32 1, %s516_s11  ;;  %p43_p1 = scmp.ne.s32.totalorder %s516_s11, %s512_s10 }
   0x8   : > { %s736_s18 = smov (%p25_p0, %s24_s18), 0  ;;  %s738_s19 = smov (!%p25_p0, %s27_s19), %s532_s15 }
   0x9   : > { %s32_s21 = ssub.s32 %s528_s14, %s736_s18  ;;  %p44_p2 = scmp.eq.s32.totalorder %s536_s16, 0 }
   0xa   : > { %p29_p3 = scmp.ge.s32.totalorder %s738_s19, 2  ;;  %p49_p4 = scmp.ne.s32.totalorder %s512_s10, %s508_s9 }
   0xb   : > { %p608_p5 = por %p44_p2, %p43_p1  ;;  %p50_p6 = scmp.eq.s32.totalorder %s342_s17, 0 }
   0xc   : > { %s740_s19 = smov (%p29_p3, %s738_s19), 0  ;;  %p364_p8 = scmp.lt.s32.totalorder %s536_s16, 6 }
   0xd   : > { %p614_p7 = por %p50_p6, %p49_p4  ;;  %s31_s24 = ssub.s32 %s532_s15, %s740_s19 }
   0xe   : > { %s33_s25 = sor.u32 %s32_s21, %s31_s24  ;;  %s125_s26 = sand.u32 1, %s516_s11  }
   0xf   : > { %p34_p9 = scmp.eq.s32.totalorder %s33_s25, 0  ;;  %s346_s27 = sshll.u32 %s125_s26, 3 }
  0x10   : > { %s357_s28 = smul.u32 3, %s532_s15  ;;  %s129_s4 = scalar_lea.vmem [#allocation5], %s346_s27 }
  0x11   : > { %s624_s29 = scalar_select %p34_p9, %s516_s11, %s36_s20  }
  0x12   : > { %s134_s30 = sadd.s32 %s528_s14, %s357_s28  ;;  %s138_s5 = sshll.u32 %s129_s4, 4  ;;  %s632_s5 = int_to_ptr.vmem [resolvable:$true] %s138_s5 }
  0x13   : > { %s347_s3 = sshll.u32 %s134_s30, 7  ;;  %p638_p10 = pnand %p364_p8, %p608_p5 }
  0x14   : > { %s630_s8 = scalar_lea.hbm %s720_s0, %s347_s3  ;;  %s126_s17 = scalar_lea.sflag [#allocation6], %s125_s26 }
  0x15   : > { %s440_s20 = scalar_lea.hbm %s630_s8, 128  ;;  %p442_p0 = pneg %p638_p10 }
  0x16   : > { %p441_p13 = scmp.ne.s32.totalorder %s630_s8, %s440_s20  ;;  %s445_s24 = scalar_lea.hbm %s720_s0, 768 }
  0x17   : > { %p446_p3 = scmp.lt.u32.totalorder %s630_s8, %s720_s0  ;;  %p447_p4 = scmp.lt.u32.totalorder %s445_s24, %s440_s20 }
  0x18   : > { %p443_p1 = pnand %p442_p0, %p441_p13  ;;  %p449_p6 = scmp.lt.u32.totalorder %s440_s20, %s630_s8 }
  0x19   : > { %p448_p5 = por %p447_p4, %p446_p3 }
  0x1a   : > { %p444_p2 = pneg %p443_p1 }
  0x1b   : > { %p450_p8 = por %p449_p6, %p448_p5 }
  0x1d   : > { %p451_p9 = pnand %p450_p8, %p444_p2 }
  0x1f   : > { %454 = shalt.err (!%p451_p9)
}
  0x20   : > { %s455_s26 = scalar_lea.vmem %s632_s5, 128  ;;  %s538_s28 = smov [#allocation5]  }
  0x21   : > { %p456_p13 = scmp.ne.s32.totalorder %s632_s5, %s455_s26  ;;  %s460_s30 = sshll.u32 %s538_s28, 4  ;;  %s461_s30 = int_to_ptr.vmem [resolvable:$false] %s460_s30 }
  0x22   : > { %s462_s3 = scalar_lea.vmem %s461_s30, 256  ;;  %p463_p12 = scmp.lt.s32.totalorder %s632_s5, %s461_s30 }
  0x23   : > { %p458_p1 = pnand %p456_p13, %p442_p0  ;;  %p464_p3 = scmp.lt.s32.totalorder %s462_s3, %s455_s26 }
  0x25   : > { %p459_p11 = pneg %p458_p1  ;;  %p465_p4 = por %p464_p3, %p463_p12 }
  0x27   : > { %p466_p5 = pnand %p465_p4, %p459_p11 }
  0x29   : > { %469 = shalt.err (!%p466_p5)
}
  0x2a   : > { %363 = dma.hbm_to_vmem [thread:$0]  (!%p638_p10), %s630_s8, 128, %s632_s5, %s126_s17  }
  0x2b   : > { %p726_p2 = scmp.lt.s32.totalorder %s536_s16, 7  ;;  %p727_p6 = scmp.ge.s32.totalorder %s536_s16, 1 }
  0x2d   : > { %p151_p0 = pnand %p727_p6, %p726_p2 }
  0x2e   : > { %s156_s4 = sand.u32 (!%p151_p0), 1, %s512_s10  }
  0x2f   : > { %154 = sbr.rel (%p151_p0) target bundleno = 522 (0x20a), region = 28  ;;  %s349_s6 = sshll.u32 (!%p151_p0), %s156_s4, 3 }
  0x30   : > { %s157_s7 = scalar_lea.sflag (!%p151_p0), [#allocation6], %s156_s4  ;;  %s160_s20 = scalar_lea.vmem (!%p151_p0), [#allocation5], %s349_s6 }
  0x36   : > { %503 = dma.done.wait (%p614_p7), %s157_s7, 128  }
  0x37   : > { %505 = vsyncadd (%p614_p7), %s157_s7, 4294967168  ;;  %p184_p11 = scmp.lt.s32.totalorder %s524_s13, 1  ;;  %p352_p10 = scmp.ne.s32.totalorder %s520_s12, 0 }
  0x38   : > { %vm196_vm0 = vcmask (!%p352_p10), 7168   ;;  %v539_v0 = vmov (!%p352_p10), -inf   ;;  %v540_v1 = vmov (!%p352_p10), 0.0  }
  0x39   : > { %s742_s13 = smov (!%p184_p11, %s524_s13), 1  ;;  %195 = sbr.rel (%p352_p10) target bundleno = 64 (0x40), region = 36 }
  0x3a   : > { %s350_s5 = sshll.u32 %s742_s13, 3  ;;  %197 = vst.msk [vmem:[#allocation2] sm:$0xff] (!%p352_p10), %vm196_vm0, %v539_v0  ;;  %198 = vst.msk [vmem:[#allocation3] sm:$0xff] (!%p352_p10), %vm196_vm0, %v540_v1 }
  0x3b   : > { %s187_s17 = scalar_lea.vmem %s721_s1, %s350_s5  ;;  %s686_s24 = scalar_lea.vmem %s722_s2, %s350_s5  ;;  %199 = vst.msk [vmem:[#allocation4] sm:$0xff] (!%p352_p10), %vm196_vm0, %v540_v1 }
  0x40 PF: > { %v200_v2 = vld [vmem:[%s160_s20] sm:$0xff]  ;;  %v541_v3 = vmov 0   ;;  %vm222_vm1 = vcmask 7168   ;;  %v226_v11 = vlaneseq  ;;  %s353_s13 = sshll.u32 %s520_s12, 7  ;;  %p354_p7 = scmp.ne.s32.totalorder %s520_s12, 2 }
  0x41   : > { %202 = vmax.xlane.f32.xlu0 %v200_v2  ;;  %433 = vset.pattern.permute.xlu1 %v541_v3  ;;  %v201_v4 = vld [vmem:[%s187_s17] sm:$0xff]  ;;  %v228_v14 = vstv %s353_s13  ;;  %v217_v21 = vld [vmem:[#allocation3] sm:$0xff] }
  0x42   : > { %432 = vset.pattern.permute.xlu0 %v541_v3  ;;  %232 = vperm.xlu1 %433, %v201_v4   ;;  %v204_v5 = vld [vmem:[#allocation2] sm:$0xff]  ;;  %v227_v13 = vand.u32 127, %v226_v11  ;;  %v230_v25 = vld [vmem:[#allocation4] sm:$0xff] }
  0x44   : > { %v229_v15 = vadd.s32 %v228_v14, %v227_v13 }
  0xc1   : > { %v233_v16 = vpop.permute.xlu1 %232 }
  0xc2   : > { %vm234_vm2 = vcmp.eq.s32.totalorder %v229_v15, %v233_v16 }
  0xc3   : > { %v235_v18 = vsel %vm234_vm2, %v200_v2, 0.0 }
  0xce   : > { %v203_v6 = vpop.xlane.xlu0 %202 }
  0xcf   : > { %v205_v7 = vmax.f32 %v204_v5, %v203_v6 }
  0xd1   : > { %v206_v8 = vsub.f32 %v204_v5, %v205_v7  ;;  %224 = vst.msk [vmem:[#allocation2] sm:$0xff] %vm222_vm1, %v205_v7  ;;  %211 = vperm.xlu0 %432, %v205_v7  }
  0xd3   : > { %v207_v19 = vmul.f32 1.442695, %v206_v8 }
  0xd8   : > { %v244_v30 = vld [vmem:[#allocation2] sm:$0xff] (!%p354_p7) }
 0x150   : > { %v212_v9 = vpop.permute.xlu0 %211 }
 0x151   : > { %v214_v10 = vsub.f32 %v200_v2, %v212_v9 }
 0x153   : > { %v215_v12 = vmul.f32 1.442695, %v214_v10 }
 0x155   : > { %434 = vpow2.f32 %v215_v12 }
 0x156   : > { %436 = vpow2.f32 %v207_v19 }
 0x15f   : > { %v435_v17 = vpop.eup %434 }
 0x160   : > { %219 = vadd.xlane.f32.xlu1 %v435_v17  ;;  %v437_v20 = vpop.eup %436 }
 0x161   : > { %v218_v22 = vmul.f32 %v437_v20, %v217_v21 }
 0x164   : > { %236 = vadd.xlane.f32.xlu1 %v235_v18 }
 0x1ed   : > { %v220_v23 = vpop.xlane.xlu1 %219 }
 0x1ee   : > { %v221_v24 = vadd.f32 %v220_v23, %v218_v22  ;;  %243 = sbr.rel (%p354_p7) target bundleno = 522 (0x20a), region = 40 }
 0x1f0   : > { %223 = vst.msk [vmem:[#allocation3] sm:$0xff] %vm222_vm1, %v221_v24 }
 0x1f1   : > { %v237_v26 = vpop.xlane.xlu1 %236 }
 0x1f2   : > { %v238_v27 = vadd.f32 %v237_v26, %v230_v25 }
 0x1f4   : > { %239 = vst.msk [vmem:[#allocation4] sm:$0xff] %vm222_vm1, %v238_v27 }
 0x1f7   : > { %v245_v28 = vld [vmem:[#allocation3] sm:$0xff] }
 0x1f8   : > { %438 = vlog2.f32 %v245_v28 }
 0x1fb   : > { %v249_v32 = vld [vmem:[#allocation4] sm:$0xff] }
 0x202   : > { %v439_v29 = vpop.eup %438 }
 0x203   : > { %v247_v31 = vmul.f32 0.6931472, %v439_v29 }
 0x205   : > { %v248_v33 = vadd.f32 %v247_v31, %v244_v30 }
 0x207   : > { %v250_v34 = vsub.f32 %v248_v33, %v249_v32 }
 0x209   : > { %251 = vst.msk [vmem:[%s686_s24] sm:$0xff] %vm222_vm1, %v250_v34 }
 0x20a PF: > { %s15_s16 = sadd.s32 1, %s536_s16   ;;  %s728_s9 = smov %s512_s10 }
 0x20b   : > { %p12_p12 = scmp.ge.s32.totalorder %s15_s16, 8   ;;  %s729_s10 = smov %s516_s11 }
 0x20c   : > { %s730_s11 = smov %s624_s29  ;;  %s731_s12 = smov %s528_s14 }
 0x20d   : > { %s732_s13 = smov %s532_s15  ;;  %s733_s14 = smov %s736_s18 }
 0x20e   : > { %s734_s15 = smov %s740_s19  ;;  %14 = sbr.rel (!%p12_p12) target bundleno = 5 (0x5), region = 79 }
 0x215   :  { %271 = vsyncpa [#allocation6], 1 }
 0x216   :  { %273 = vsyncpa [#allocation6 + $0x1], 1 }

</bundles_post_ra>
